<compile_context>
chip_gen: v6e
topology: v6e:2x2x1
jax: 0.10.0
libtpu: 0.0.40
codegen_flags: <defaults>
</compile_context>

<pallas_src>
import math
from functools import partial

import jax
import jax.numpy as jnp
from jax.experimental import pallas as pl
from jax.experimental.pallas import tpu as pltpu

_INV_SQRT2 = 1.0 / math.sqrt(2.0)
_TM = 1024                      # time-tile target for the conv matmul (v7x-safe, good on v5e/v6e)
_GN_T_TILE = 2048               # time-tile target for the GN/GELU apply kernel
_VMEM_LIMIT = 48 * 1024 * 1024  # below v7x's 64 MiB physical VMEM; ample headroom on v5e/v6e


def _round_up(x, m):
    return (x + m - 1) // m * m


def _pick_tile(n, target):
    """Largest power-of-two tile <= target that divides n (n is a multiple of 8)."""
    t = target
    while t >= 8:
        if n % t == 0:
            return t
        t //= 2
    return 8


def _gelu_exact(x):
    # torch.nn.GELU default == exact (erf-based) GELU
    return 0.5 * x * (1.0 + jax.lax.erf(x * _INV_SQRT2))


# ---------------------------------------------------------------------------
# Kernel 1: conv-as-matmul with VMEM-resident weight.
#   grid = (B, Tp//tm); x block (tm, K), weight block = full (K, Np) with constant
#   index_map, output (tm, Np).  Single K block => no accumulator scratch; MXU dot
#   with f32 accumulation, optional fused exact-GELU epilogue, optional per-tile
#   partial GroupNorm statistics (column sum / sumsq of the pre-activation output).
# ---------------------------------------------------------------------------
def _conv_matmul_kernel(x_ref, w_ref, o_ref, *stats_refs, apply_gelu, with_stats):
    y = jnp.dot(x_ref[...], w_ref[...], preferred_element_type=jnp.float32)
    if with_stats:
        # Padded time rows are all-zero patches -> contribute 0 to both sums.
        n = y.shape[1]
        s1 = jnp.broadcast_to(jnp.sum(y, axis=0, keepdims=True), (4, n))
        s2 = jnp.broadcast_to(jnp.sum(y * y, axis=0, keepdims=True), (4, n))
        stats_refs[0][...] = jnp.concatenate([s1, s2], axis=0)  # rows 0-3: sum, 4-7: sumsq
    if apply_gelu:
        y = _gelu_exact(y)
    o_ref[...] = y.astype(o_ref.dtype)


def conv_matmul(patches, w2, *, tm, apply_gelu, with_stats):
    """patches: (B, Tp, K) bf16 with Tp % tm == 0; w2: (K, Np) bf16, Np % 128 == 0.
    Returns out (B, Tp, Np) bf16 [, stats (B, Tp//tm, 8, Np) f32]."""
    B, Tp, K = patches.shape
    K2, Np = w2.shape
    assert K == K2 and Np % 128 == 0 and Tp % tm == 0
    n_t = Tp // tm

    out_shape = [jax.ShapeDtypeStruct((B, Tp, Np), jnp.bfloat16)]
    out_specs = [pl.BlockSpec((None, tm, Np), lambda b, i: (b, i, 0))]
    if with_stats:
        out_shape.append(jax.ShapeDtypeStruct((B, n_t, 8, Np), jnp.float32))
        out_specs.append(pl.BlockSpec((None, None, 8, Np), lambda b, i: (b, i, 0, 0)))

    res = pl.pallas_call(
        partial(_conv_matmul_kernel, apply_gelu=apply_gelu, with_stats=with_stats),
        out_shape=tuple(out_shape),
        grid=(B, n_t),
        in_specs=[
            pl.BlockSpec((None, tm, K), lambda b, i: (b, i, 0)),
            # constant block index => the whole weight panel is DMA'd once and stays resident
            pl.BlockSpec((K, Np), lambda b, i: (0, 0)),
        ],
        out_specs=tuple(out_specs),
        compiler_params=pltpu.CompilerParams(
            dimension_semantics=("parallel", "parallel"),
            vmem_limit_bytes=_VMEM_LIMIT),
        cost_estimate=pl.CostEstimate(
            flops=2 * B * Tp * K * Np,
            transcendentals=B * Tp * Np if apply_gelu else 0,
            bytes_accessed=2 * (B * Tp * K + K * Np + B * Tp * Np)),
    )(patches, w2)
    return res if with_stats else res[0]


# ---------------------------------------------------------------------------
# Kernel 2: single-pass GroupNorm-apply + exact GELU.
#   Statistics were produced by the layer-0 conv epilogue; the wrapper folds them into
#   per-(batch, channel) scale = rstd*gamma and shift = beta - mean*scale, so this kernel
#   is a pure elementwise stream: y = gelu(x*scale + shift).
# ---------------------------------------------------------------------------
def _gn_gelu_kernel(x_ref, scale_ref, shift_ref, o_ref):
    x = x_ref[...].astype(jnp.float32)           # (t_tile, Cp)
    y = x * scale_ref[...] + shift_ref[...]      # (1, Cp) broadcasts
    o_ref[...] = _gelu_exact(y).astype(o_ref.dtype)


def gn_gelu_apply(h, scale, shift):
    """h: (B, Tp, Cp) bf16; scale/shift: (B, 1, Cp) f32."""
    B, Tp, Cp = h.shape
    t_tile = _pick_tile(Tp, _GN_T_TILE)
    return pl.pallas_call(
        _gn_gelu_kernel,
        out_shape=jax.ShapeDtypeStruct((B, Tp, Cp), jnp.bfloat16),
        grid=(B, Tp // t_tile),
        in_specs=[
            pl.BlockSpec((None, t_tile, Cp), lambda b, t: (b, t, 0)),
            pl.BlockSpec((None, 1, Cp), lambda b, t: (b, 0, 0)),
            pl.BlockSpec((None, 1, Cp), lambda b, t: (b, 0, 0)),
        ],
        out_specs=pl.BlockSpec((None, t_tile, Cp), lambda b, t: (b, t, 0)),
        compiler_params=pltpu.CompilerParams(
            dimension_semantics=("parallel", "parallel"),
            vmem_limit_bytes=_VMEM_LIMIT),
        cost_estimate=pl.CostEstimate(
            flops=4 * B * Tp * Cp,
            transcendentals=B * Tp * Cp,
            bytes_accessed=2 * 2 * B * Tp * Cp),
    )(h, scale, shift)


# ---------------------------------------------------------------------------
# Parameter init (mirrors nn.init.kaiming_normal_ on the conv weight and the default
# GroupNorm affine init).  Channels are padded once to multiples of 128 and the weight
# is pre-flattened to (k*C_in_p, C_out_p) bf16 matching the (time, tap, channel) im2col
# order, so every kernel output stays lane-dense and no per-layer re-pad is needed.
# ---------------------------------------------------------------------------
def init_params(key, conv_layers):
    params = []
    in_d, in_p = 1, 1   # true / padded input channels of the current layer (raw signal: 1)
    for i, (dim, k, _stride) in enumerate(conv_layers):
        key, sub = jax.random.split(key)
        std = math.sqrt(2.0 / (in_d * k))   # kaiming_normal_, fan_in mode, gain=sqrt(2)
        w = jax.random.normal(sub, (dim, in_d, k), dtype=jnp.float32) * std
        out_p = _round_up(dim, 128)
        w_pad = jnp.zeros((out_p, in_p, k), jnp.float32).at[:dim, :in_d, :].set(w)
        w2 = jnp.transpose(w_pad, (2, 1, 0)).reshape(k * in_p, out_p)  # (k*C_in_p, C_out_p)
        p = {"w2": w2.astype(jnp.bfloat16), "w_raw": w}   # w_raw only used by the f32 reference
        if i == 0:   # mode='default' => GroupNorm on the first block only
            p["gn_gamma"] = jnp.zeros((out_p,), jnp.float32).at[:dim].set(1.0)
            p["gn_beta"] = jnp.zeros((out_p,), jnp.float32)
        params.append(p)
        in_d, in_p = dim, out_p
    return params


# ---------------------------------------------------------------------------
# Forward pass.  Glue (strided-slice im2col, small stat reductions) in plain JAX;
# all heavy traffic (conv matmul, GN-apply + GELU) in Pallas.
# ---------------------------------------------------------------------------
def conv_feature_extraction_forward(x, params, conv_layers):
    # x: (B, T) raw signal  (PyTorch: x.unsqueeze(1) -> (B, 1, T))
    B = x.shape[0]
    h = x[:, :, None].astype(jnp.bfloat16)   # channels-last (B, T, 1), bf16 activations
    t_valid = x.shape[1]                     # valid (unpadded) time length of h
    for i, ((dim, k, stride), p) in enumerate(zip(conv_layers, params)):
        c_in = h.shape[2]
        t_out = (t_valid - k) // stride + 1
        tm = min(_TM, _round_up(t_out, 8))
        Tp = _round_up(t_out, tm)

        # im2col without an XLA gather: pure reshape when k == stride, else k strided
        # slices stacked in (time, tap, channel) order (matches the w2 flattening).
        if k == stride:
            patches = h[:, :t_out * k, :].reshape(B, t_out, k * c_in)
        else:
            span = (t_out - 1) * stride + 1
            taps = [jax.lax.slice_in_dim(h, j, j + span, stride=stride, axis=1)
                    for j in range(k)]
            patches = jnp.stack(taps, axis=2).reshape(B, t_out, k * c_in)
        if Tp != t_out:   # pad only the time axis; the (zero-row) padding is carried forward
            patches = jnp.pad(patches, ((0, 0), (0, Tp - t_out), (0, 0)))

        if i == 0:   # 'default' mode: Conv -> Fp32GroupNorm(dim, dim) -> GELU
            out, stats = conv_matmul(patches, p["w2"], tm=tm,
                                     apply_gelu=False, with_stats=True)
            inv_t = 1.0 / t_out
            s1 = jnp.sum(stats[:, :, 0, :], axis=1)          # (B, Np) column sums
            s2 = jnp.sum(stats[:, :, 4, :], axis=1)          # (B, Np) column sums of squares
            mean = s1 * inv_t
            var = s2 * inv_t - mean * mean                   # biased variance (torch GN)
            rstd = jax.lax.rsqrt(jnp.maximum(var, 0.0) + 1e-5)
            scale = rstd * p["gn_gamma"][None, :]            # (B, Np); gamma/beta zero in padding
            shift = p["gn_beta"][None, :] - mean * scale
            h = gn_gelu_apply(out, scale[:, None, :], shift[:, None, :])
        else:        # Conv -> GELU fused in the matmul epilogue
            h = conv_matmul(patches, p["w2"], tm=tm, apply_gelu=True, with_stats=False)
        t_valid = t_out

    dim_last = conv_layers[-1][0]
    # drop time/channel padding, match PyTorch output layout (B, C_out, T_out), back to f32
    return jnp.transpose(h[:, :t_valid, :dim_last], (0, 2, 1)).astype(jnp.float32)


# ---------------------------------------------------------------------------
# Pure-JAX f32 reference mirroring the PyTorch module (loose drift check only).
# ---------------------------------------------------------------------------
def _reference_forward(x, params, conv_layers):
    h = x[:, None, :].astype(jnp.float32)                    # (B, 1, T)
    for i, ((dim, k, stride), p) in enumerate(zip(conv_layers, params)):
        h = jax.lax.conv_general_dilated(
            h, p["w_raw"], window_strides=(stride,), padding="VALID",
            dimension_numbers=("NCH", "OIH", "NCH"))
        if i == 0:   # GroupNorm(dim, dim): per-(batch, channel) stats over time
            mean = jnp.mean(h, axis=2, keepdims=True)
            var = jnp.var(h, axis=2, keepdims=True)
            h = (h - mean) * jax.lax.rsqrt(var + 1e-5)       # gamma=1, beta=0
        h = 0.5 * h * (1.0 + jax.lax.erf(h * _INV_SQRT2))
    return h


if __name__ == "__main__":
    conv_layers = [(32, 3, 2), (32, 3, 2)]   # (dim, kernel, stride) per layer
    B, T = 2, 64

    key = jax.random.PRNGKey(0)
    key, xk = jax.random.split(key)
    x = jax.random.normal(xk, (B, T), dtype=jnp.float32)
    params = init_params(key, conv_layers)

    fwd = jax.jit(partial(conv_feature_extraction_forward, conv_layers=conv_layers))
    out = jax.block_until_ready(fwd(x, params))

    # expected: T -> (64-3)//2+1 = 31 -> (31-3)//2+1 = 15 ; output (B, 32, 15)
    assert out.shape == (B, 32, 15), out.shape
    assert bool(jnp.all(jnp.isfinite(out)))
    ref = _reference_forward(x, params, conv_layers)
    assert float(jnp.max(jnp.abs(out - ref))) < 0.15   # bf16 activations => loose tolerance
    print("KERNEL_OK")
</pallas_src>

<mosaic_0001>
module attributes {stable_mosaic.version = 11 : i64} {
  func.func @_conv_matmul_kernel(%arg0: i32, %arg1: i32, %arg2: memref<1x32x3xbf16, #tpu.memory_space<vmem>>, %arg3: memref<3x128xbf16, #tpu.memory_space<vmem>>, %arg4: memref<1x32x128xbf16, #tpu.memory_space<vmem>>, %arg5: memref<1x1x8x128xf32, #tpu.memory_space<vmem>>) attributes {dimension_semantics = [#tpu.dimension_semantics<parallel>, #tpu.dimension_semantics<parallel>], iteration_bounds = array<i64: 2, 1>, scalar_prefetch = 0 : i64, scratch_operands = 0 : i64, tpu.core_type = #tpu.core_type<tc>, window_params = [{transform_indices = @transform_0, window_bounds = array<i64: 1, 32, 3>}, {pipeline_mode = #tpu.pipeline_mode<synchronous>, transform_indices = @transform_1, window_bounds = array<i64: 3, 128>}, {transform_indices = @transform_2, window_bounds = array<i64: 1, 32, 128>}, {transform_indices = @transform_3, window_bounds = array<i64: 1, 1, 8, 128>}]} {
    %c0 = arith.constant 0 : index
    %c0_0 = arith.constant 0 : index
    %c0_1 = arith.constant 0 : index
    %0 = vector.load %arg2[%c0, %c0_0, %c0_1] : memref<1x32x3xbf16, #tpu.memory_space<vmem>>, vector<1x32x3xbf16>
    %1 = vector.shape_cast %0 : vector<1x32x3xbf16> to vector<32x3xbf16>
    %c0_2 = arith.constant 0 : index
    %c0_3 = arith.constant 0 : index
    %2 = vector.load %arg3[%c0_2, %c0_3] : memref<3x128xbf16, #tpu.memory_space<vmem>>, vector<3x128xbf16>
    %cst = arith.constant dense<0.000000e+00> : vector<32x128xf32>
    %3 = tpu.matmul %1, %2, %cst {dimension_numbers = #tpu.dot_dimension_numbers<[1], [0], [0], [1], [0, 0, 1, 1], [], []>} : vector<32x3xbf16>, vector<3x128xbf16>, vector<32x128xf32> -> vector<32x128xf32>
    %cst_4 = arith.constant dense<0.000000e+00> : vector<128xf32>
    %4 = vector.multi_reduction <add>, %3, %cst_4 [0] : vector<32x128xf32> to vector<128xf32>
    %5 = vector.shape_cast %4 : vector<128xf32> to vector<1x128xf32>
    %6 = vector.shape_cast %5 : vector<1x128xf32> to vector<1x128xf32>
    %7 = vector.broadcast %6 : vector<1x128xf32> to vector<4x128xf32>
    %8 = arith.mulf %3, %3 : vector<32x128xf32>
    %cst_5 = arith.constant dense<0.000000e+00> : vector<128xf32>
    %9 = vector.multi_reduction <add>, %8, %cst_5 [0] : vector<32x128xf32> to vector<128xf32>
    %10 = vector.shape_cast %9 : vector<128xf32> to vector<1x128xf32>
    %11 = vector.shape_cast %10 : vector<1x128xf32> to vector<1x128xf32>
    %12 = vector.broadcast %11 : vector<1x128xf32> to vector<4x128xf32>
    %13 = tpu.concatenate %7, %12 in 0 : vector<4x128xf32>, vector<4x128xf32> -> vector<8x128xf32>
    %c0_6 = arith.constant 0 : index
    %c0_7 = arith.constant 0 : index
    %c0_8 = arith.constant 0 : index
    %c0_9 = arith.constant 0 : index
    %14 = vector.load %arg5[%c0_6, %c0_7, %c0_8, %c0_9] : memref<1x1x8x128xf32, #tpu.memory_space<vmem>>, vector<1x1x8x128xf32>
    %15 = vector.shape_cast %14 : vector<1x1x8x128xf32> to vector<8x128xf32>
    %16 = vector.shape_cast %13 : vector<8x128xf32> to vector<1x1x8x128xf32>
    tpu.vector_store %arg5[%c0_6, %c0_7, %c0_8, %c0_9], %16 {strides = array<i32>} : memref<1x1x8x128xf32, #tpu.memory_space<vmem>>, vector<1x1x8x128xf32>,
    %17 = arith.truncf %3 : vector<32x128xf32> to vector<32x128xbf16>
    %c0_10 = arith.constant 0 : index
    %c0_11 = arith.constant 0 : index
    %c0_12 = arith.constant 0 : index
    %18 = vector.load %arg4[%c0_10, %c0_11, %c0_12] : memref<1x32x128xbf16, #tpu.memory_space<vmem>>, vector<1x32x128xbf16>
    %19 = vector.shape_cast %18 : vector<1x32x128xbf16> to vector<32x128xbf16>
    %20 = vector.shape_cast %17 : vector<32x128xbf16> to vector<1x32x128xbf16>
    tpu.vector_store %arg4[%c0_10, %c0_11, %c0_12], %20 {strides = array<i32>} : memref<1x32x128xbf16, #tpu.memory_space<vmem>>, vector<1x32x128xbf16>,
    return
  }
  func.func @transform_0(%arg0: i32, %arg1: i32) -> (i32, i32, i32) {
    %c0_i32 = arith.constant 0 : i32
    %c0_i32_0 = arith.constant 0 : i32
    return %arg0, %arg1, %c0_i32 : i32, i32, i32
  }
  func.func @transform_1(%arg0: i32, %arg1: i32) -> (i32, i32) {
    %c0_i32 = arith.constant 0 : i32
    %c0_i32_0 = arith.constant 0 : i32
    %c0_i32_1 = arith.constant 0 : i32
    return %c0_i32, %c0_i32_0 : i32, i32
  }
  func.func @transform_2(%arg0: i32, %arg1: i32) -> (i32, i32, i32) {
    %c0_i32 = arith.constant 0 : i32
    %c0_i32_0 = arith.constant 0 : i32
    return %arg0, %arg1, %c0_i32 : i32, i32, i32
  }
  func.func @transform_3(%arg0: i32, %arg1: i32) -> (i32, i32, i32, i32) {
    %c0_i32 = arith.constant 0 : i32
    %c0_i32_0 = arith.constant 0 : i32
    %c0_i32_1 = arith.constant 0 : i32
    return %arg0, %arg1, %c0_i32, %c0_i32_0 : i32, i32, i32, i32
  }
}

module attributes {stable_mosaic.version = 11 : i64} {
  func.func @_gn_gelu_kernel(%arg0: i32, %arg1: i32, %arg2: memref<1x32x128xbf16, #tpu.memory_space<vmem>>, %arg3: memref<1x1x128xf32, #tpu.memory_space<vmem>>, %arg4: memref<1x1x128xf32, #tpu.memory_space<vmem>>, %arg5: memref<1x32x128xbf16, #tpu.memory_space<vmem>>) attributes {dimension_semantics = [#tpu.dimension_semantics<parallel>, #tpu.dimension_semantics<parallel>], iteration_bounds = array<i64: 2, 1>, scalar_prefetch = 0 : i64, scratch_operands = 0 : i64, tpu.core_type = #tpu.core_type<tc>, window_params = [{transform_indices = @transform_0, window_bounds = array<i64: 1, 32, 128>}, {transform_indices = @transform_1, window_bounds = array<i64: 1, 1, 128>}, {transform_indices = @transform_2, window_bounds = array<i64: 1, 1, 128>}, {transform_indices = @transform_3, window_bounds = array<i64: 1, 32, 128>}]} {
    %c0 = arith.constant 0 : index
    %c0_0 = arith.constant 0 : index
    %c0_1 = arith.constant 0 : index
    %0 = vector.load %arg2[%c0, %c0_0, %c0_1] : memref<1x32x128xbf16, #tpu.memory_space<vmem>>, vector<1x32x128xbf16>
    %1 = vector.shape_cast %0 : vector<1x32x128xbf16> to vector<32x128xbf16>
    %2 = arith.extf %1 : vector<32x128xbf16> to vector<32x128xf32>
    %c0_2 = arith.constant 0 : index
    %c0_3 = arith.constant 0 : index
    %c0_4 = arith.constant 0 : index
    %3 = vector.load %arg3[%c0_2, %c0_3, %c0_4] : memref<1x1x128xf32, #tpu.memory_space<vmem>>, vector<1x1x128xf32>
    %4 = vector.shape_cast %3 : vector<1x1x128xf32> to vector<1x128xf32>
    %5 = vector.broadcast %4 : vector<1x128xf32> to vector<32x128xf32>
    %6 = arith.mulf %2, %5 : vector<32x128xf32>
    %c0_5 = arith.constant 0 : index
    %c0_6 = arith.constant 0 : index
    %c0_7 = arith.constant 0 : index
    %7 = vector.load %arg4[%c0_5, %c0_6, %c0_7] : memref<1x1x128xf32, #tpu.memory_space<vmem>>, vector<1x1x128xf32>
    %8 = vector.shape_cast %7 : vector<1x1x128xf32> to vector<1x128xf32>
    %9 = vector.broadcast %8 : vector<1x128xf32> to vector<32x128xf32>
    %10 = arith.addf %6, %9 : vector<32x128xf32>
    %cst = arith.constant 5.000000e-01 : f32
    %11 = vector.broadcast %cst : f32 to vector<32x128xf32>
    %12 = arith.mulf %11, %10 : vector<32x128xf32>
    %cst_8 = arith.constant 0.707106769 : f32
    %13 = vector.broadcast %cst_8 : f32 to vector<32x128xf32>
    %14 = arith.mulf %10, %13 : vector<32x128xf32>
    %15 = math.erf %14 : vector<32x128xf32>
    %cst_9 = arith.constant 1.000000e+00 : f32
    %16 = vector.broadcast %cst_9 : f32 to vector<32x128xf32>
    %17 = arith.addf %16, %15 : vector<32x128xf32>
    %18 = arith.mulf %12, %17 : vector<32x128xf32>
    %19 = arith.truncf %18 : vector<32x128xf32> to vector<32x128xbf16>
    %c0_10 = arith.constant 0 : index
    %c0_11 = arith.constant 0 : index
    %c0_12 = arith.constant 0 : index
    %20 = vector.load %arg5[%c0_10, %c0_11, %c0_12] : memref<1x32x128xbf16, #tpu.memory_space<vmem>>, vector<1x32x128xbf16>
    %21 = vector.shape_cast %20 : vector<1x32x128xbf16> to vector<32x128xbf16>
    %22 = vector.shape_cast %19 : vector<32x128xbf16> to vector<1x32x128xbf16>
    tpu.vector_store %arg5[%c0_10, %c0_11, %c0_12], %22 {strides = array<i32>} : memref<1x32x128xbf16, #tpu.memory_space<vmem>>, vector<1x32x128xbf16>,
    return
  }
  func.func @transform_0(%arg0: i32, %arg1: i32) -> (i32, i32, i32) {
    %c0_i32 = arith.constant 0 : i32
    %c0_i32_0 = arith.constant 0 : i32
    return %arg0, %arg1, %c0_i32 : i32, i32, i32
  }
  func.func @transform_1(%arg0: i32, %arg1: i32) -> (i32, i32, i32) {
    %c0_i32 = arith.constant 0 : i32
    %c0_i32_0 = arith.constant 0 : i32
    %c0_i32_1 = arith.constant 0 : i32
    return %arg0, %c0_i32, %c0_i32_0 : i32, i32, i32
  }
  func.func @transform_2(%arg0: i32, %arg1: i32) -> (i32, i32, i32) {
    %c0_i32 = arith.constant 0 : i32
    %c0_i32_0 = arith.constant 0 : i32
    %c0_i32_1 = arith.constant 0 : i32
    return %arg0, %c0_i32, %c0_i32_0 : i32, i32, i32
  }
  func.func @transform_3(%arg0: i32, %arg1: i32) -> (i32, i32, i32) {
    %c0_i32 = arith.constant 0 : i32
    %c0_i32_0 = arith.constant 0 : i32
    return %arg0, %arg1, %c0_i32 : i32, i32, i32
  }
}

module attributes {stable_mosaic.version = 11 : i64} {
  func.func @_conv_matmul_kernel(%arg0: i32, %arg1: i32, %arg2: memref<1x16x384xbf16, #tpu.memory_space<vmem>>, %arg3: memref<384x128xbf16, #tpu.memory_space<vmem>>, %arg4: memref<1x16x128xbf16, #tpu.memory_space<vmem>>) attributes {dimension_semantics = [#tpu.dimension_semantics<parallel>, #tpu.dimension_semantics<parallel>], iteration_bounds = array<i64: 2, 1>, scalar_prefetch = 0 : i64, scratch_operands = 0 : i64, tpu.core_type = #tpu.core_type<tc>, window_params = [{transform_indices = @transform_0, window_bounds = array<i64: 1, 16, 384>}, {pipeline_mode = #tpu.pipeline_mode<synchronous>, transform_indices = @transform_1, window_bounds = array<i64: 384, 128>}, {transform_indices = @transform_2, window_bounds = array<i64: 1, 16, 128>}]} {
    %c0 = arith.constant 0 : index
    %c0_0 = arith.constant 0 : index
    %c0_1 = arith.constant 0 : index
    %0 = vector.load %arg2[%c0, %c0_0, %c0_1] : memref<1x16x384xbf16, #tpu.memory_space<vmem>>, vector<1x16x384xbf16>
    %1 = vector.shape_cast %0 : vector<1x16x384xbf16> to vector<16x384xbf16>
    %c0_2 = arith.constant 0 : index
    %c0_3 = arith.constant 0 : index
    %2 = vector.load %arg3[%c0_2, %c0_3] : memref<384x128xbf16, #tpu.memory_space<vmem>>, vector<384x128xbf16>
    %cst = arith.constant dense<0.000000e+00> : vector<16x128xf32>
    %3 = tpu.matmul %1, %2, %cst {dimension_numbers = #tpu.dot_dimension_numbers<[1], [0], [0], [1], [0, 0, 1, 1], [], []>} : vector<16x384xbf16>, vector<384x128xbf16>, vector<16x128xf32> -> vector<16x128xf32>
    %cst_4 = arith.constant 5.000000e-01 : f32
    %4 = vector.broadcast %cst_4 : f32 to vector<16x128xf32>
    %5 = arith.mulf %4, %3 : vector<16x128xf32>
    %cst_5 = arith.constant 0.707106769 : f32
    %6 = vector.broadcast %cst_5 : f32 to vector<16x128xf32>
    %7 = arith.mulf %3, %6 : vector<16x128xf32>
    %8 = math.erf %7 : vector<16x128xf32>
    %cst_6 = arith.constant 1.000000e+00 : f32
    %9 = vector.broadcast %cst_6 : f32 to vector<16x128xf32>
    %10 = arith.addf %9, %8 : vector<16x128xf32>
    %11 = arith.mulf %5, %10 : vector<16x128xf32>
    %12 = arith.truncf %11 : vector<16x128xf32> to vector<16x128xbf16>
    %c0_7 = arith.constant 0 : index
    %c0_8 = arith.constant 0 : index
    %c0_9 = arith.constant 0 : index
    %13 = vector.load %arg4[%c0_7, %c0_8, %c0_9] : memref<1x16x128xbf16, #tpu.memory_space<vmem>>, vector<1x16x128xbf16>
    %14 = vector.shape_cast %13 : vector<1x16x128xbf16> to vector<16x128xbf16>
    %15 = vector.shape_cast %12 : vector<16x128xbf16> to vector<1x16x128xbf16>
    tpu.vector_store %arg4[%c0_7, %c0_8, %c0_9], %15 {strides = array<i32>} : memref<1x16x128xbf16, #tpu.memory_space<vmem>>, vector<1x16x128xbf16>,
    return
  }
  func.func @transform_0(%arg0: i32, %arg1: i32) -> (i32, i32, i32) {
    %c0_i32 = arith.constant 0 : i32
    %c0_i32_0 = arith.constant 0 : i32
    return %arg0, %arg1, %c0_i32 : i32, i32, i32
  }
  func.func @transform_1(%arg0: i32, %arg1: i32) -> (i32, i32) {
    %c0_i32 = arith.constant 0 : i32
    %c0_i32_0 = arith.constant 0 : i32
    %c0_i32_1 = arith.constant 0 : i32
    return %c0_i32, %c0_i32_0 : i32, i32
  }
  func.func @transform_2(%arg0: i32, %arg1: i32) -> (i32, i32, i32) {
    %c0_i32 = arith.constant 0 : i32
    %c0_i32_0 = arith.constant 0 : i32
    return %arg0, %arg1, %c0_i32 : i32, i32, i32
  }
}

</mosaic_0001>

<bundles_post_ra>
// kernel: conv_feature_extraction_forward.4
= control target key start
LH: loop header
LB: loop body
LE: loop exit
PB: predicated region body
PF: predicated region fallthrough
CT: control target
= control target key end

     0   :  { %s532_s12 = smov 0   ;;  %s534_s13 = smov 0   ;;  %s580_s0 = inlined_call_operand.vmem [shape: bf16[2,32,128], index: 0, kind: input, shape index: {}]   ;;  %s581_s1 = inlined_call_operand.vmem [shape: f32[2,1,128], index: 1, kind: input, shape index: {}]   ;;  %s582_s2 = inlined_call_operand.vmem [shape: f32[2,1,128], index: 2, kind: input, shape index: {}]   ;;  %s583_s3 = inlined_call_operand.vmem [shape: bf16[2,32,128], index: 3, kind: output, shape index: {}]  }
   0x1   :  { %s536_s14 = smov 0  }
   0x2 LB: > { %s25_s15 = sadd.s32 1, %s506_s13  ;;  %p417_p0 = scmp.ge.s32.totalorder %s510_s14, 1  ;;  %s510_s14 = sphi %s536_s14, %s13_s14   ;;  %s506_s13 = sphi %s534_s13, %s585_s13   ;;  %s502_s12 = sphi %s532_s12, %s584_s12  }
   0x3   : > { %p27_p1 = scmp.ge.s32.totalorder %s25_s15, 2  ;;  %p174_p2 = scmp.lt.s32.totalorder %s510_s14, 3 }
   0x5   : > { %s587_s15 = smov (%p27_p1, %s25_s15), 0  ;;  %p175_p3 = pnand %p417_p0, %p174_p2 }
   0x6   : > { %p213_p4 = scmp.lt.s32.totalorder (!%p175_p3), %s502_s12, 1 }
   0x7   : > { %178 = sbr.rel (%p175_p3) target bundleno = 48 (0x30), region = 32 }
   0xc   : > { %s589_s12 = smov (!%p213_p4, %s502_s12), 1 }
   0xd   : > { %s430_s16 = sshll.u32 %s589_s12, 4  ;;  %s224_s19 = scalar_lea.vmem %s581_s1, %s589_s12 }
   0xe   : > { %s220_s22 = scalar_lea.vmem %s580_s0, %s430_s16  ;;  %s227_s25 = scalar_lea.vmem %s582_s2, %s589_s12  ;;  %v422_v2 = vld [vmem:[%s224_s19] ss:$0 sm:$0xff] }
   0xf   : > { %v437_v0 = vld [vmem:[%s220_s22] sm:$0xff]   ;;  %v454_v1 = vld [vmem:[%s220_s22 + $0x8] sm:$0xff]   ;;  %s236_s28 = scalar_lea.vmem %s583_s3, %s430_s16 }
  0x10   : > { %v438_v3 = vunpack.c.l.bf16 %v437_v0  ;;  %v439_v4 = vunpack.c.h.bf16 %v437_v0  ;;  %v442_v5 = vunpack.c.l.bf16 %v454_v1  ;;  %v443_v6 = vunpack.c.h.bf16 %v454_v1  ;;  %v423_v7 = vld [vmem:[%s227_s25] ss:$0 sm:$0xff] }
  0x12   : > { %v253_v8 = vmul.f32 %v438_v3, %v422_v2  ;;  %v254_v9 = vmul.f32 %v439_v4, %v422_v2  ;;  %v255_v10 = vmul.f32 %v442_v5, %v422_v2  ;;  %v256_v11 = vmul.f32 %v443_v6, %v422_v2 }
  0x14   : > { %v264_v12 = vadd.f32 %v423_v7, %v253_v8  ;;  %v265_v13 = vadd.f32 %v423_v7, %v254_v9  ;;  %v266_v14 = vadd.f32 %v423_v7, %v255_v10  ;;  %v267_v15 = vadd.f32 %v423_v7, %v256_v11 }
  0x16   : > { %v272_v16 = vmul.f32 0.70710677, %v264_v12  ;;  %v273_v17 = vmul.f32 0.70710677, %v265_v13  ;;  %v274_v18 = vmul.f32 0.70710677, %v266_v14 }
  0x17   : > { %v275_v19 = vmul.f32 0.70710677, %v267_v15  ;;  %v268_v20 = vmul.f32 0.5, %v264_v12  ;;  %v269_v22 = vmul.f32 0.5, %v265_v13  ;;  %v270_v25 = vmul.f32 0.5, %v266_v14 }
  0x18   : > { %480 = verf.f32 %v272_v16  ;;  %v271_v28 = vmul.f32 0.5, %v267_v15 }
  0x19   : > { %482 = verf.f32 %v273_v17 }
  0x1a   : > { %484 = verf.f32 %v274_v18 }
  0x1b   : > { %486 = verf.f32 %v275_v19 }
  0x25   : > { %v481_v21 = vpop.eup %480 }
  0x26   : > { %v483_v23 = vpop.eup %482  ;;  %v280_v24 = vadd.f32 1.0, %v481_v21 }
  0x27   : > { %v485_v26 = vpop.eup %484  ;;  %v281_v27 = vadd.f32 1.0, %v483_v23 }
  0x28   : > { %v487_v29 = vpop.eup %486  ;;  %v284_v30 = vmul.f32 %v280_v24, %v268_v20  ;;  %v282_v31 = vadd.f32 1.0, %v485_v26 }
  0x29   : > { %v285_v32 = vmul.f32 %v281_v27, %v269_v22  ;;  %v283_v33 = vadd.f32 1.0, %v487_v29 }
  0x2a   : > { %v286_v34 = vmul.f32 %v282_v31, %v270_v25 }
  0x2b   : > { %v447_v35 = vpack.c.bf16 %v285_v32, %v284_v30  ;;  %v287_v36 = vmul.f32 %v283_v33, %v271_v28 }
  0x2d   : > { %448 = vst [vmem:[%s236_s28] sm:$0xff] %v447_v35   ;;  %v452_v37 = vpack.c.bf16 %v287_v36, %v286_v34 }
  0x2f   : > { %455 = vst [vmem:[%s236_s28 + $0x8] sm:$0xff] %v452_v37  }
  0x30 PF: > { %s13_s14 = sadd.s32 1, %s510_s14   ;;  %s584_s12 = smov %s506_s13 }
  0x31   : > { %p10_p5 = scmp.ge.s32.totalorder %s13_s14, 4   ;;  %s585_s13 = smov %s587_s15 }
  0x33   :  { %12 = sbr.rel (!%p10_p5) target bundleno = 2 (0x2), region = 68 }

// kernel: conv_feature_extraction_forward.3
= control target key start
LH: loop header
LB: loop body
LE: loop exit
PB: predicated region body
PF: predicated region fallthrough
CT: control target
= control target key end

     0   :  { %s599_s12 = smov 0   ;;  %s601_s13 = smov 0   ;;  %s642_s0 = inlined_call_operand.vmem [shape: bf16[2,32,3], index: 0, kind: input, shape index: {}]   ;;  %s643_s1 = inlined_call_operand.vmem [shape: bf16[3,128], index: 1, kind: input, shape index: {}]   ;;  %s644_s2 = inlined_call_operand.vmem [shape: bf16[2,32,128], index: 2, kind: output, shape index: {0}]   ;;  %s645_s3 = inlined_call_operand.vmem [shape: f32[2,1,8,128], index: 3, kind: output, shape index: {1}]  }
   0x1   :  { %s603_s14 = smov 0  }
   0x2 LB: > { %s26_s15 = sadd.s32 1, %s572_s13  ;;  %p485_p0 = scmp.ge.s32.totalorder %s576_s14, 1  ;;  %s576_s14 = sphi %s603_s14, %s14_s14   ;;  %s572_s13 = sphi %s601_s13, %s647_s13   ;;  %s568_s12 = sphi %s599_s12, %s646_s12  }
   0x3   : > { %p28_p1 = scmp.ge.s32.totalorder %s26_s15, 2  ;;  %p163_p2 = scmp.lt.s32.totalorder %s576_s14, 3 }
   0x5   : > { %s649_s15 = smov (%p28_p1, %s26_s15), 0  ;;  %p164_p3 = pnand %p485_p0, %p163_p2 }
   0x6   : > { %p203_p4 = scmp.lt.s32.totalorder (!%p164_p3), %s568_s12, 1 }
   0x7   : > { %167 = sbr.rel (%p164_p3) target bundleno = 242 (0xf2), region = 28 }
   0xc   : > { %v234_v0 = vld [vmem:[%s643_s1] sm:$0x3]  ;;  %vm252_vm0 = vcmask 1040384   ;;  %vm253_vm1 = vcmask 1041408   ;;  %v578_v1 = vmov 65535   ;;  %s651_s12 = smov (!%p203_p4, %s568_s12), 1 }
   0xd   : > { %v254_v2 = vsel %vm252_vm0, 4294967295, %v578_v1  ;;  %s501_s18 = sshll.u32 %s651_s12, 4  ;;  %vm245_vm2 = vcmask 23552   ;;  %s490_s25 = sshll.u32 %s651_s12, 3  ;;  %vm330_vm3 = vcmask 1043456  }
   0xe   : > { %v255_v3 = vsel %vm253_vm1, %v254_v2, 0  ;;  %s210_s21 = scalar_lea.vmem %s642_s0, %s501_s18  ;;  %s220_s24 = scalar_lea.vmem %s644_s2, %s501_s18 }
   0xf   : > { %v257_v4 = vand.u32 %v255_v3, %v234_v0  ;;  %v552_v5 = vld [vmem:[%s210_s21] sm:$0xff]   ;;  %v553_v6 = vld [vmem:[%s210_s21 + $0x8] sm:$0xff]   ;;  %s228_s28 = scalar_lea.vmem %s645_s3, %s490_s25 }
  0x10   : > { %523 = vmatprep.mubr.msk.bf16.mxu0 %vm245_vm2, %v552_v5 }
  0x11   : > { %521 = vmatprep.subr.bf16.mxu0 %v257_v4 }
  0x12   : > { %522 = vmatpush3.bf16.msra.mxu0 %v257_v4 }
  0x15   : > { %524 = vmatmul.mubr.msk.bf16.vlgmr.msra.gmra.mxu0 %vm245_vm2, %v553_v6 }
  0xd5   : > { %v525_v7 = vpop.f32.mrf.mxu0 }
  0xd6   : > { %v319_v16 = vmul.f32 %v525_v7, %v525_v7 }
  0xd7   : > { %v293_v8 = vpop.f32.mrf.mxu0 }
  0xd8   : > { %v317_v12 = vmul.f32 %v293_v8, %v293_v8 }
  0xd9   : > { %v526_v9 = vpop.f32.mrf.mxu0 }
  0xda   : > { %v515_v10 = vpack.c.bf16 %v526_v9, %v525_v7  ;;  %v320_v19 = vmul.f32 %v526_v9, %v526_v9 }
  0xdb   : > { %v296_v11 = vpop.f32.mrf.mxu0 }
  0xdc   : > { %v308_v13 = vadd.f32 %v296_v11, %v293_v8  ;;  %v318_v14 = vmul.f32 %v296_v11, %v296_v11  ;;  %v510_v15 = vpack.c.bf16 %v296_v11, %v293_v8  ;;  %517 = vst [vmem:[%s220_s24 + $0x8] sm:$0xff] %v515_v10  }
  0xde   : > { %v309_v17 = vadd.f32 %v525_v7, %v308_v13  ;;  %v321_v18 = vadd.f32 %v318_v14, %v317_v12  ;;  %511 = vst [vmem:[%s220_s24] sm:$0xff] %v510_v15  }
  0xe0   : > { %v310_v20 = vadd.f32 %v526_v9, %v309_v17  ;;  %v322_v21 = vadd.f32 %v321_v18, %v319_v16 }
  0xe2   : > { %v311_v22 = vrot.slane %v310_v20, 4  ;;  %v323_v23 = vadd.f32 %v322_v21, %v320_v19 }
  0xe4   : > { %v312_v24 = vadd.f32 %v311_v22, %v310_v20  ;;  %v324_v25 = vrot.slane %v323_v23, 4 }
  0xe6   : > { %v313_v26 = vrot.slane %v312_v24, 2  ;;  %v325_v27 = vadd.f32 %v324_v25, %v323_v23 }
  0xe8   : > { %v314_v28 = vadd.f32 %v313_v26, %v312_v24  ;;  %v326_v29 = vrot.slane %v325_v27, 2 }
  0xea   : > { %v315_v30 = vrot.slane %v314_v28, 1  ;;  %v327_v31 = vadd.f32 %v326_v29, %v325_v27 }
  0xec   : > { %v328_v32 = vrot.slane %v327_v31, 1  ;;  %v316_v33 = vadd.f32 %v315_v30, %v314_v28 }
  0xee   : > { %v329_v34 = vadd.f32 %v328_v32, %v327_v31 }
  0xf0   : > { %v331_v35 = vsel %vm330_vm3, %v316_v33, %v329_v34 }
  0xf1   : > { %332 = vst [vmem:[%s228_s28] sm:$0xff] %v331_v35 }
  0xf2 PF: > { %s14_s14 = sadd.s32 1, %s576_s14   ;;  %s646_s12 = smov %s572_s13 }
  0xf3   : > { %p11_p5 = scmp.ge.s32.totalorder %s14_s14, 4   ;;  %s647_s13 = smov %s649_s15 }
  0xf5   :  { %13 = sbr.rel (!%p11_p5) target bundleno = 2 (0x2), region = 70 }

// kernel: conv_feature_extraction_forward.5
= control target key start
LH: loop header
LB: loop body
LE: loop exit
PB: predicated region body
PF: predicated region fallthrough
CT: control target
= control target key end

     0   :  { %s789_s9 = smov 0   ;;  %s791_s10 = smov 0   ;;  %s902_s0 = inlined_call_operand.vmem [shape: bf16[2,16,384], index: 0, kind: input, shape index: {}]   ;;  %s903_s1 = inlined_call_operand.vmem [shape: bf16[384,128], index: 1, kind: input, shape index: {}]   ;;  %s904_s2 = inlined_call_operand.vmem [shape: bf16[2,16,128], index: 2, kind: output, shape index: {}]  }
   0x1   :  { %s793_s11 = smov 0  }
   0x2 LB: > { %s24_s12 = sadd.s32 1, %s766_s10  ;;  %p595_p0 = scmp.ge.s32.totalorder %s770_s11, 1  ;;  %s770_s11 = sphi %s793_s11, %s12_s11   ;;  %s766_s10 = sphi %s791_s10, %s906_s10   ;;  %s762_s9 = sphi %s789_s9, %s905_s9  }
   0x3   : > { %p26_p1 = scmp.ge.s32.totalorder %s24_s12, 2  ;;  %p134_p2 = scmp.lt.s32.totalorder %s770_s11, 3 }
   0x5   : > { %s908_s12 = smov (%p26_p1, %s24_s12), 0  ;;  %p135_p3 = pnand %p595_p0, %p134_p2 }
   0x6   : > { %p166_p4 = scmp.lt.s32.totalorder (!%p135_p3), %s762_s9, 1 }
   0x7   : > { %138 = sbr.rel (%p135_p3) target bundleno = 272 (0x110), region = 28 }
   0xc   : > { %v716_v0 = vld [vmem:[%s903_s1 + $0x78] sm:$0xff]   ;;  %v772_v1 = vmov 0.0   ;;  %vm773_vm0 = vmmov 0   ;;  %v719_v4 = vld [vmem:[%s903_s1 + $0x70] sm:$0xff]   ;;  %v722_v7 = vld [vmem:[%s903_s1 + $0x68] sm:$0xff]   ;;  %s910_s9 = smov (!%p166_p4, %s762_s9), 1 }
   0xd   : > { %669 = vmatprep.subr.bf16.mxu1 %v772_v1  ;;  %v717_v2 = vld [vmem:[%s903_s1 + $0xb8] sm:$0xff]   ;;  %638 = vmatprep.subr.bf16.mxu0 %v716_v0  ;;  %v720_v5 = vld [vmem:[%s903_s1 + $0xb0] sm:$0xff]   ;;  %v723_v8 = vld [vmem:[%s903_s1 + $0xa8] sm:$0xff]   ;;  %s689_s21 = smul.u32 24, %s910_s9  ;;  %s630_s17 = sshll.u32 %s910_s9, 3 }
   0xe   : > { %v718_v3 = vld [vmem:[%s903_s1 + $0x38] sm:$0xff]   ;;  %685 = vmatprep.mubr.msk.bf16.mxu1 %vm773_vm0, %v772_v1  ;;  %670 = vmatpush3.bf16.msra.mxu1 %v717_v2  ;;  %v721_v6 = vld [vmem:[%s903_s1 + $0x30] sm:$0xff]   ;;  %v724_v9 = vld [vmem:[%s903_s1 + $0x28] sm:$0xff]   ;;  %s184_s20 = scalar_lea.vmem %s904_s2, %s630_s17 }
   0xf   : > { %639 = vmatpush3.bf16.msra.mxu0 %v718_v3  ;;  %671 = vmatprep.subr.bf16.mxu1 %v772_v1  ;;  %v725_v10 = vld [vmem:[%s903_s1 + $0x60] sm:$0xff]   ;;  %v728_v13 = vld [vmem:[%s903_s1 + $0x58] sm:$0xff]   ;;  %v731_v16 = vld [vmem:[%s903_s1 + $0x50] sm:$0xff]   ;;  %s174_s4 = scalar_lea.vmem %s902_s0, %s689_s21 }
  0x10   : > { %640 = vmatprep.subr.bf16.mxu0 %v719_v4  ;;  %v726_v11 = vld [vmem:[%s903_s1 + $0xa0] sm:$0xff]   ;;  %v729_v14 = vld [vmem:[%s903_s1 + $0x98] sm:$0xff]   ;;  %v732_v17 = vld [vmem:[%s903_s1 + $0x90] sm:$0xff]  }
  0x11   : > { %v727_v12 = vld [vmem:[%s903_s1 + $0x20] sm:$0xff]   ;;  %v730_v15 = vld [vmem:[%s903_s1 + $0x18] sm:$0xff]   ;;  %v733_v18 = vld [vmem:[%s903_s1 + $0x10] sm:$0xff]  }
  0x12   : > { %672 = vmatpush3.bf16.msra.mxu1 %v720_v5  ;;  %v734_v19 = vld [vmem:[%s903_s1 + $0x48] sm:$0xff]   ;;  %v737_v22 = vld [vmem:[%s903_s1 + $0x40] sm:$0xff]  }
  0x13   : > { %641 = vmatpush3.bf16.msra.mxu0 %v721_v6  ;;  %673 = vmatprep.subr.bf16.mxu1 %v772_v1  ;;  %v735_v20 = vld [vmem:[%s903_s1 + $0x88] sm:$0xff]   ;;  %v742_v23 = vld [vmem:[%s174_s4 + $0x4] ss:$12 sps:$4 sm:$0xff]  }
  0x14   : > { %642 = vmatprep.subr.bf16.mxu0 %v722_v7  ;;  %v736_v21 = vld [vmem:[%s903_s1 + $0x8] sm:$0xff]   ;;  %v738_v24 = vld [vmem:[%s903_s1 + $0x80] sm:$0xff]   ;;  %431 = vmatprep.mubr.bf16.mxu0 %v742_v23 }
  0x15   : > { %v739_v25 = vld [vmem:[%s903_s1] sm:$0xff]   ;;  %v743_v26 = vld [vmem:[%s174_s4 + $0x8] ss:$12 sps:$4 sm:$0xff]  }
  0x16   : > { %674 = vmatpush3.bf16.msra.mxu1 %v723_v8  ;;  %v740_v27 = vld [vmem:[%s174_s4] ss:$12 sps:$4 sm:$0xff]  }
  0x17   : > { %643 = vmatpush3.bf16.msra.mxu0 %v724_v9  ;;  %675 = vmatprep.subr.bf16.mxu1 %v772_v1 }
  0x18   : > { %644 = vmatprep.subr.bf16.mxu0 %v725_v10 }
  0x1a   : > { %676 = vmatpush3.bf16.msra.mxu1 %v726_v11 }
  0x1b   : > { %645 = vmatpush3.bf16.msra.mxu0 %v727_v12  ;;  %677 = vmatprep.subr.bf16.mxu1 %v772_v1 }
  0x1c   : > { %646 = vmatprep.subr.bf16.mxu0 %v728_v13 }
  0x1e   : > { %678 = vmatpush3.bf16.msra.mxu1 %v729_v14 }
  0x1f   : > { %647 = vmatpush3.bf16.msra.mxu0 %v730_v15  ;;  %679 = vmatprep.subr.bf16.mxu1 %v772_v1 }
  0x20   : > { %648 = vmatprep.subr.bf16.mxu0 %v731_v16 }
  0x22   : > { %680 = vmatpush3.bf16.msra.mxu1 %v732_v17 }
  0x23   : > { %649 = vmatpush3.bf16.msra.mxu0 %v733_v18  ;;  %681 = vmatprep.subr.bf16.mxu1 %v772_v1 }
  0x24   : > { %650 = vmatprep.subr.bf16.mxu0 %v734_v19 }
  0x26   : > { %682 = vmatpush3.bf16.msra.mxu1 %v735_v20 }
  0x27   : > { %651 = vmatpush3.bf16.msra.mxu0 %v736_v21  ;;  %683 = vmatprep.subr.bf16.mxu1 %v772_v1 }
  0x28   : > { %652 = vmatprep.subr.bf16.mxu0 %v737_v22 }
  0x2a   : > { %684 = vmatpush3.bf16.msra.mxu1 %v738_v24 }
  0x2b   : > { %653 = vmatpush3.bf16.msra.mxu0 %v739_v25 }
  0x2d   : > { %686 = vmatmul.mubr.bf16.vlgmr.msra.gmra.mxu1 %v743_v26 }
  0x2e   : > { %432 = vmatmul.mubr.bf16.vlgmr.msra.gmra.mxu0 %v740_v27 }
  0xed   : > { %v474_v28 = vpop.f32.mrf.mxu1 }
  0xee   : > { %v654_v29 = vpop.f32.mrf.mxu0 }
  0xef   : > { %v687_v30 = vpop.f32.mrf.mxu1 }
  0xf0   : > { %v655_v31 = vpop.f32.mrf.mxu0 }
  0xf1   : > { %v656_v32 = vadd.f32 %v655_v31, %v654_v29  ;;  %v477_v33 = vpop.f32.mrf.mxu1 }
  0xf2   : > { %v657_v34 = vpop.f32.mrf.mxu0 }
  0xf3   : > { %v475_v35 = vadd.f32 %v656_v32, %v474_v28  ;;  %v688_v36 = vpop.f32.mrf.mxu1 }
  0xf4   : > { %v658_v37 = vpop.f32.mrf.mxu0 }
  0xf5   : > { %v483_v38 = vmul.f32 0.70710677, %v475_v35  ;;  %v659_v39 = vadd.f32 %v658_v37, %v657_v34  ;;  %v481_v45 = vmul.f32 0.5, %v475_v35 }
  0xf7   : > { %744 = verf.f32 %v483_v38  ;;  %v478_v40 = vadd.f32 %v659_v39, %v477_v33 }
  0xf9   : > { %v484_v41 = vmul.f32 0.70710677, %v478_v40  ;;  %v482_v46 = vmul.f32 0.5, %v478_v40 }
  0xfb   : > { %746 = verf.f32 %v484_v41 }
 0x104   : > { %v745_v42 = vpop.eup %744 }
 0x105   : > { %v487_v43 = vadd.f32 1.0, %v745_v42 }
 0x107   : > { %v489_v48 = vmul.f32 %v487_v43, %v481_v45 }
 0x108   : > { %v747_v44 = vpop.eup %746 }
 0x109   : > { %v488_v47 = vadd.f32 1.0, %v747_v44 }
 0x10b   : > { %v490_v49 = vmul.f32 %v488_v47, %v482_v46 }
 0x10d   : > { %v636_v50 = vpack.c.bf16 %v490_v49, %v489_v48 }
 0x10f   : > { %637 = vst [vmem:[%s184_s20] sm:$0xff] %v636_v50  }
 0x110 PF: > { %s12_s11 = sadd.s32 1, %s770_s11   ;;  %s905_s9 = smov %s766_s10 }
 0x111   : > { %p9_p5 = scmp.ge.s32.totalorder %s12_s11, 4   ;;  %s906_s10 = smov %s908_s12 }
 0x113   :  { %11 = sbr.rel (!%p9_p5) target bundleno = 2 (0x2), region = 58 }

</bundles_post_ra>
